<compile_context>
chip_gen: v6e
topology: v6e:2x2x1
jax: 0.10.0
libtpu: 0.0.40
codegen_flags: <defaults>
</compile_context>

<pallas_src>
import numpy as np
import jax
import jax.numpy as jnp
from jax.experimental import pallas as pl
from jax.experimental.pallas import tpu as pltpu

_LANE = 128                      # lane width: batch tile must be a multiple of this
_MAX_TB = 32768                  # max batch tile (lanes); ~20 MiB working set, see above
_VMEM_LIMIT = 32 * 1024 * 1024   # explicit scoped-VMEM limit (safe on v5e/v6e/v7x)
_NO = 32                         # output rows: 16 real + 16 imag flattened 4x4 entries
_NC = 8                          # padded coefficient count (5 used: [1, K1r, K2r, K1i, K2i])


# ----------------------------------------------------------------------------
# Lattice / basis-matrix construction (host-side glue; analytic constants)
# ----------------------------------------------------------------------------
def _lattice_basis(l, alpha, w0, Omega):
    x = np.array([1.0, 0.0])
    y = np.array([0.0, 1.0])
    a1 = np.sqrt(3.0) * l * x
    a2 = (np.sqrt(3.0) * x + 3.0 * y) * l / 2.0
    r1 = (a1 + a2) / 3.0
    r2 = (-2.0 * a1 + a2) / 3.0
    r3 = (a1 - 2.0 * a2) / 3.0

    def unit(v):
        return v / np.linalg.norm(v)

    r1h, r2h, r3h = unit(r1), unit(r2), unit(r3)
    r11 = np.outer(r1h, r1h)
    r22 = np.outer(r2h, r2h)
    r33 = np.outer(r3h, r3h)
    z = np.array([[0.0, 1.0], [-1.0, 0.0]])
    g1 = (1.0 - alpha) * np.outer(z @ r1h, z @ r1h) + r11
    g2 = (1.0 - alpha) * np.outer(z @ r2h, z @ r2h) + r22
    g3 = (1.0 - alpha) * np.outer(z @ r3h, z @ r3h) + r33
    sy = np.array([[0.0, -1.0j], [1.0j, 0.0]], dtype=np.complex128)

    diag = (w0 ** 2) * (r11 + r22 + r33) * (2.0 - alpha) - 2.0 * Omega * sy  # 2x2

    # Complex basis matrices for coefficients [1, conj(K1), conj(K2), K1, K2]
    B = np.zeros((5, 4, 4), dtype=np.complex128)
    B[0, :2, :2] = diag
    B[0, 2:, 2:] = diag
    B[0, :2, 2:] = -(w0 ** 2) * g1
    B[0, 2:, :2] = -(w0 ** 2) * g1
    B[1, :2, 2:] = -(w0 ** 2) * g2   # coeff conj(K1)
    B[2, :2, 2:] = -(w0 ** 2) * g3   # coeff conj(K2)
    B[3, 2:, :2] = -(w0 ** 2) * g2   # coeff K1
    B[4, 2:, :2] = -(w0 ** 2) * g3   # coeff K2

    # Re-express with purely real coefficients [1, K1r, K2r, K1i, K2i]:
    #   conj(K1) B1 + K1 B3 = K1r (B1+B3) + K1i * i (B3-B1), same for K2.
    D = np.zeros((5, 4, 4), dtype=np.complex128)
    D[0] = B[0]
    D[1] = B[1] + B[3]
    D[2] = B[2] + B[4]
    D[3] = 1j * (B[3] - B[1])
    D[4] = 1j * (B[4] - B[2])
    Dflat = D.reshape(5, 16)

    # Fused basis: rows 0..15 real part, rows 16..31 imag part; columns = coefficients
    BT = np.zeros((_NO, _NC), np.float32)
    BT[0:16, 0:5] = Dflat.real.T
    BT[16:32, 0:5] = Dflat.imag.T
    return a1, a2, BT


def _phase_matrix(a1, a2):
    """(16, 8) matrix P so that  P @ kpack  (kpack rows = [krx, kry, kix, kiy, 1, 0,0,0])
    yields rows 0..7  = cos-arguments [0, p1r, p2r, p1r-π/2, p2r-π/2, 0, 0, 0]
           rows 8..15 = exp-arguments [0, p1i, p2i, p1i,     p2i,     0, 0, 0]
    so that exp(rows 8..15) * cos(rows 0..7) = [1, K1r, K2r, K1i, K2i, 1, 1, 1]."""
    a1x, a1y = float(a1[0]), float(a1[1])
    a2x, a2y = float(a2[0]), float(a2[1])
    P = np.zeros((16, 8), np.float32)
    # cos-argument rows
    P[1, 0], P[1, 1] = a1x, a1y
    P[2, 0], P[2, 1] = a2x, a2y
    P[3, 0], P[3, 1], P[3, 4] = a1x, a1y, -np.pi / 2.0
    P[4, 0], P[4, 1], P[4, 4] = a2x, a2y, -np.pi / 2.0
    # exp-argument rows
    P[9, 2], P[9, 3] = a1x, a1y
    P[10, 2], P[10, 3] = a2x, a2y
    P[11, 2], P[11, 3] = a1x, a1y
    P[12, 2], P[12, 3] = a2x, a2y
    return P


# ----------------------------------------------------------------------------
# Pallas kernel: two small MXU matmuls + two dense EUP ops, fully dense stores
# ----------------------------------------------------------------------------
def _ribbon_kernel(k_ref, c_ref, o_ref):
    # k_ref: (8, TB)  rows = [Re kx, Re ky, Im kx, Im ky, 1, 0, 0, 0] ; batch on lanes
    # c_ref: (48, 8)  rows 0..15 = phase matrix P ; rows 16..47 = fused basis BT
    # o_ref: (32, TB) rows 0..15 = Re(H) flattened row-major, rows 16..31 = Im(H)
    pmat = c_ref[0:16, :]                                                  # (16, 8)
    bt = c_ref[16:48, :]                                                   # (32, 8)
    ph = jnp.dot(pmat, k_ref[...], preferred_element_type=jnp.float32)    # (16, TB)
    # coefficients [1, K1r, K2r, K1i, K2i, 1, 1, 1] (last 3 hit zero basis columns)
    coef = jnp.exp(ph[8:16, :]) * jnp.cos(ph[0:8, :])                     # (8, TB)
    o_ref[...] = jnp.dot(bt, coef, preferred_element_type=jnp.float32)    # (32, TB)


def _choose_tile(B, max_tile):
    """Pick a lane-aligned batch tile and padded batch (minimal padding, no forced
    grid split — single-TC parts get one big tile; multi-tile grids appear naturally
    for large B and are marked 'parallel' for multi-TensorCore parts)."""
    lane_groups = -(-B // _LANE)                       # 128-lane groups needed
    max_groups = max(1, max_tile // _LANE)
    n_tiles = -(-lane_groups // max_groups)
    groups_per_tile = -(-lane_groups // n_tiles)
    tb = groups_per_tile * _LANE
    bp = n_tiles * tb
    return tb, bp


# ----------------------------------------------------------------------------
# Wrapper: jit-fused packing / pallas_call / complex re-assembly, cached per (B, Ω)
# ----------------------------------------------------------------------------
class RibbonHamiltonianPallas:
    def __init__(self, l=1.0, alpha=0.3, w0=1.0, perturbation=True, max_tile=_MAX_TB):
        self.l = l
        self.alpha = alpha
        self.w0 = w0
        self.perturbation = perturbation
        self.max_tile = int(max_tile)
        self._fns = {}

    def _build(self, B, Omega):
        a1, a2, BT = _lattice_basis(self.l, self.alpha, self.w0, Omega)
        P = _phase_matrix(a1, a2)
        consts_np = np.concatenate([P, BT], axis=0)          # (48, 8) f32
        TB, Bp = _choose_tile(B, self.max_tile)

        pc = pl.pallas_call(
            _ribbon_kernel,
            out_shape=jax.ShapeDtypeStruct((_NO, Bp), jnp.float32),
            grid_spec=pltpu.PrefetchScalarGridSpec(
                num_scalar_prefetch=0,
                grid=(Bp // TB,),
                in_specs=[
                    pl.BlockSpec((8, TB), lambda i: (0, i)),     # k (lane-tiled)
                    pl.BlockSpec((48, 8), lambda i: (0, 0)),     # constants (resident)
                ],
                out_specs=pl.BlockSpec((_NO, TB), lambda i: (0, i)),
            ),
            compiler_params=pltpu.CompilerParams(
                dimension_semantics=("parallel",),
                vmem_limit_bytes=_VMEM_LIMIT),
        )

        def fwd(k):
            # k: (B, 2, 1) complex  ->  H: (B, 4, 4) complex64
            k2 = jnp.reshape(k, (B, 2))
            kr = jnp.real(k2).astype(jnp.float32)                        # (B, 2)
            ki = jnp.imag(k2).astype(jnp.float32)                        # (B, 2)
            rows = jnp.concatenate([kr, ki], axis=1).T                   # (4, B)
            kpack = jnp.concatenate(
                [rows,
                 jnp.ones((1, B), jnp.float32),                          # bias row
                 jnp.zeros((3, B), jnp.float32)], axis=0)                # (8, B)
            kpack = jnp.pad(kpack, ((0, 0), (0, Bp - B)))                # (8, Bp)

            out = pc(kpack, jnp.asarray(consts_np))                      # (32, Bp)
            Hr = out[0:16, :B]
            Hi = out[16:32, :B]
            H = (Hr + 1j * Hi).T.reshape(B, 4, 4)
            return H.astype(jnp.complex64)

        return jax.jit(fwd)

    def __call__(self, k, Omega):
        B = int(k.shape[0])
        key = (B, float(Omega))
        fn = self._fns.get(key)
        if fn is None:
            fn = self._build(B, float(Omega))
            self._fns[key] = fn
        return fn(k)


# ----------------------------------------------------------------------------
# Literal numpy reference (mirrors the torch perturbation branch, complex128)
# ----------------------------------------------------------------------------
def _reference(k_np, Omega, l, alpha, w0):
    x = np.array([[1.0], [0.0]], dtype=np.complex128)
    y = np.array([[0.0], [1.0]], dtype=np.complex128)
    a1 = np.sqrt(3.0) * l * x
    a2 = (np.sqrt(3.0) * x + 3.0 * y) * l / 2.0
    r1 = (a1 + a2) / 3.0
    r2 = (-2.0 * a1 + a2) / 3.0
    r3 = (a1 - 2.0 * a2) / 3.0
    r1h = r1 / np.linalg.norm(r1)
    r2h = r2 / np.linalg.norm(r2)
    r3h = r3 / np.linalg.norm(r3)
    r11 = r1h * r1h.conj().T
    r22 = r2h * r2h.conj().T
    r33 = r3h * r3h.conj().T
    z = np.array([[0, 1], [-1, 0]], dtype=np.complex128)
    r1_, r2_, r3_ = z @ r1h, z @ r2h, z @ r3h
    g1 = (1 - alpha) * (r1_ * r1_.conj().T) + r11
    g2 = (1 - alpha) * (r2_ * r2_.conj().T) + r22
    g3 = (1 - alpha) * (r3_ * r3_.conj().T) + r33
    sy = np.array([[0.0, -1.0j], [1.0j, 0.0]], dtype=np.complex128)

    Bsz = k_np.shape[0]
    K1 = np.squeeze(np.exp(1j * (np.conj(k_np).transpose(0, 2, 1) @ np.tile(a1, (Bsz, 1, 1)))))
    K2 = np.squeeze(np.exp(1j * (np.conj(k_np).transpose(0, 2, 1) @ np.tile(a2, (Bsz, 1, 1)))))
    K1 = np.atleast_1d(K1)
    K2 = np.atleast_1d(K2)

    Hs = np.zeros((Bsz, 4, 4), dtype=np.complex128)
    for i in range(Bsz):
        diag = (r11 + r22 + r33) * (2 - alpha) - 2 * Omega * sy / w0 ** 2
        H = w0 ** 2 * np.block([
            [diag, -(g1 + np.conj(K1[i]) * g2 + np.conj(K2[i]) * g3)],
            [-(g1 + K1[i] * g2 + K2[i] * g3), diag],
        ])
        Hs[i] = H
    return Hs


if __name__ == "__main__":
    l, alpha, w0, Omega = 1.0, 0.3, 1.0, 0.2
    model = RibbonHamiltonianPallas(l=l, alpha=alpha, w0=w0)
    # small max_tile variant so the multi-tile grid path is exercised at small shapes
    model_multitile = RibbonHamiltonianPallas(l=l, alpha=alpha, w0=w0, max_tile=128)

    root = jax.random.PRNGKey(0)
    cases = ((model, 8), (model, 200), (model_multitile, 200))
    keys = jax.random.split(root, 2 * len(cases))

    for idx, (m, test_B) in enumerate(cases):
        kr_key, ki_key = keys[2 * idx], keys[2 * idx + 1]
        k_re = jax.random.normal(kr_key, (test_B, 2, 1), dtype=jnp.float32)
        k_im = 0.1 * jax.random.normal(ki_key, (test_B, 2, 1), dtype=jnp.float32)
        k = (k_re + 1j * k_im).astype(jnp.complex64)

        H = jax.block_until_ready(m(k, Omega))

        H_ref = _reference(np.asarray(k).astype(np.complex128), Omega, l, alpha, w0)
        np.testing.assert_allclose(np.asarray(H), H_ref, rtol=1e-4, atol=1e-4)

    print("KERNEL_OK")
</pallas_src>

<mosaic_0001>
module attributes {stable_mosaic.version = 11 : i64} {
  func.func @_ribbon_kernel(%arg0: i32, %arg1: memref<8x128xf32, #tpu.memory_space<vmem>>, %arg2: memref<48x8xf32, #tpu.memory_space<vmem>>, %arg3: memref<32x128xf32, #tpu.memory_space<vmem>>) attributes {dimension_semantics = [#tpu.dimension_semantics<parallel>], iteration_bounds = array<i64: 1>, scalar_prefetch = 0 : i64, scratch_operands = 0 : i64, tpu.core_type = #tpu.core_type<tc>, window_params = [{transform_indices = @transform_0, window_bounds = array<i64: 8, 128>}, {pipeline_mode = #tpu.pipeline_mode<synchronous>, transform_indices = @transform_1, window_bounds = array<i64: 48, 8>}, {transform_indices = @transform_2, window_bounds = array<i64: 32, 128>}]} {
    %c0 = arith.constant 0 : index
    %c0_0 = arith.constant 0 : index
    %0 = vector.load %arg2[%c0, %c0_0] : memref<48x8xf32, #tpu.memory_space<vmem>>, vector<16x8xf32>
    %c16 = arith.constant 16 : index
    %c0_1 = arith.constant 0 : index
    %1 = vector.load %arg2[%c16, %c0_1] : memref<48x8xf32, #tpu.memory_space<vmem>>, vector<32x8xf32>
    %c0_2 = arith.constant 0 : index
    %c0_3 = arith.constant 0 : index
    %2 = vector.load %arg1[%c0_2, %c0_3] : memref<8x128xf32, #tpu.memory_space<vmem>>, vector<8x128xf32>
    %cst = arith.constant dense<0.000000e+00> : vector<16x128xf32>
    %3 = tpu.matmul %0, %2, %cst {dimension_numbers = #tpu.dot_dimension_numbers<[1], [0], [0], [1], [0, 0, 1, 1], [], []>} : vector<16x8xf32>, vector<8x128xf32>, vector<16x128xf32> -> vector<16x128xf32>
    %4 = vector.extract_strided_slice %3 {offsets = [8, 0], sizes = [8, 128], strides = [1, 1]} : vector<16x128xf32> to vector<8x128xf32>
    %5 = math.exp %4 : vector<8x128xf32>
    %6 = vector.extract_strided_slice %3 {offsets = [0, 0], sizes = [8, 128], strides = [1, 1]} : vector<16x128xf32> to vector<8x128xf32>
    %7 = math.cos %6 : vector<8x128xf32>
    %8 = arith.mulf %5, %7 : vector<8x128xf32>
    %cst_4 = arith.constant dense<0.000000e+00> : vector<32x128xf32>
    %9 = tpu.matmul %1, %8, %cst_4 {dimension_numbers = #tpu.dot_dimension_numbers<[1], [0], [0], [1], [0, 0, 1, 1], [], []>} : vector<32x8xf32>, vector<8x128xf32>, vector<32x128xf32> -> vector<32x128xf32>
    %c0_5 = arith.constant 0 : index
    %c0_6 = arith.constant 0 : index
    %10 = vector.load %arg3[%c0_5, %c0_6] : memref<32x128xf32, #tpu.memory_space<vmem>>, vector<32x128xf32>
    tpu.vector_store %arg3[%c0_5, %c0_6], %9 {strides = array<i32>} : memref<32x128xf32, #tpu.memory_space<vmem>>, vector<32x128xf32>,
    return
  }
  func.func @transform_0(%arg0: i32) -> (i32, i32) {
    %c0_i32 = arith.constant 0 : i32
    %c0_i32_0 = arith.constant 0 : i32
    return %c0_i32, %arg0 : i32, i32
  }
  func.func @transform_1(%arg0: i32) -> (i32, i32) {
    %c0_i32 = arith.constant 0 : i32
    %c0_i32_0 = arith.constant 0 : i32
    %c0_i32_1 = arith.constant 0 : i32
    return %c0_i32, %c0_i32_0 : i32, i32
  }
  func.func @transform_2(%arg0: i32) -> (i32, i32) {
    %c0_i32 = arith.constant 0 : i32
    %c0_i32_0 = arith.constant 0 : i32
    return %c0_i32, %arg0 : i32, i32
  }
}

</mosaic_0001>

<bundles_post_ra>
// kernel: custom-call.1
= control target key start
LH: loop header
LB: loop body
LE: loop exit
PB: predicated region body
PF: predicated region fallthrough
CT: control target
= control target key end

     0   :  { %s51_s0 = inlined_call_operand.hbm [shape: c64[8,2,1], index: 0, kind: input, shape index: {}]   ;;  %s52_s1 = inlined_call_operand.vmem [shape: f32[8,2,1], index: 1, kind: output, shape index: {}]  }
   0x1   :  { %s2_s8 = scalar_lea.hbm %s51_s0, 32 }
   0x2   :  { %3 = vsyncpa [#allocation0], 0  ;;  %s4_s11 = sshll.u32 %s52_s1, 4  ;;  %s5_s11 = int_to_ptr.vmem [resolvable:$true] %s4_s11 }
   0x3   :  { %s20_s12 = scalar_lea.vmem %s5_s11, 32  ;;  %p25_p1 = scmp.lt.s32.totalorder %s5_s11, %s5_s11 }
   0x4   :  { %p21_p0 = scmp.ne.s32.totalorder %s5_s11, %s20_s12  ;;  %p26_p2 = scmp.lt.s32.totalorder %s20_s12, %s20_s12 }
   0x6   :  { %p27_p3 = por %p26_p2, %p25_p1 }
   0x8   :  { %p28_p4 = pnand %p27_p3, %p21_p0 }
   0xa   :  { %31 = shalt.err (!%p28_p4)  }
   0xb   :  { %7 = dma.hbm_to_vmem [thread:$0]  %s2_s8, 32, %s5_s11, [#allocation0] }
   0xc   :  { %33 = dma.done.wait [#allocation0], 32  }
   0xd   :  { %34 = vsyncadd [#allocation0], 4294967264 }
   0xe   :  { %9 = vsyncpa [#allocation0], 1 }

// kernel: custom-call
= control target key start
LH: loop header
LB: loop body
LE: loop exit
PB: predicated region body
PF: predicated region fallthrough
CT: control target
= control target key end

     0   :  { %2 = vsyncpa [#allocation0], 0  ;;  %s47_s0 = inlined_call_operand.hbm [shape: c64[8,2,1], index: 0, kind: input, shape index: {}]   ;;  %s48_s1 = inlined_call_operand.vmem [shape: f32[8,2,1], index: 1, kind: output, shape index: {}]  }
   0x1   :  { %s3_s8 = sshll.u32 %s48_s1, 4  ;;  %s4_s8 = int_to_ptr.vmem [resolvable:$true] %s3_s8 }
   0x2   :  { %s17_s9 = scalar_lea.vmem %s4_s8, 32  ;;  %p22_p1 = scmp.lt.s32.totalorder %s4_s8, %s4_s8 }
   0x3   :  { %p18_p0 = scmp.ne.s32.totalorder %s4_s8, %s17_s9  ;;  %p23_p2 = scmp.lt.s32.totalorder %s17_s9, %s17_s9 }
   0x5   :  { %p24_p3 = por %p23_p2, %p22_p1 }
   0x7   :  { %p25_p4 = pnand %p24_p3, %p18_p0 }
   0x9   :  { %28 = shalt.err (!%p25_p4)  }
   0xa   :  { %6 = dma.hbm_to_vmem [thread:$0]  %s47_s0, 32, %s4_s8, [#allocation0] }
   0xb   :  { %29 = dma.done.wait [#allocation0], 32  }
   0xc   :  { %30 = vsyncadd [#allocation0], 4294967264 }
   0xd   :  { %8 = vsyncpa [#allocation0], 1 }

// kernel: custom-call.2
= control target key start
LH: loop header
LB: loop body
LE: loop exit
PB: predicated region body
PF: predicated region fallthrough
CT: control target
= control target key end

     0   :  { %s92_s0 = inlined_call_operand.vmem [shape: f32[8,4,4], index: 0, kind: input, shape index: {}]   ;;  %s93_s1 = inlined_call_operand.vmem [shape: f32[8,4,4], index: 1, kind: input, shape index: {}]   ;;  %s94_s2 = inlined_call_operand.hbm [shape: c64[8,4,4], index: 2, kind: output, shape index: {}]  }
   0x1   :  { %s3_s11 = scalar_lea.hbm %s94_s2, 256 }
   0x2   :  { %4 = vsyncpa [#allocation0], 0  ;;  %s5_s14 = sshll.u32 %s92_s0, 4  ;;  %s6_s14 = int_to_ptr.vmem [resolvable:$true] %s5_s14 }
   0x3   :  { %s18_s15 = scalar_lea.vmem %s6_s14, 256  ;;  %p23_p1 = scmp.lt.s32.totalorder %s6_s14, %s6_s14 }
   0x4   :  { %p19_p0 = scmp.ne.s32.totalorder %s6_s14, %s18_s15  ;;  %p24_p2 = scmp.lt.s32.totalorder %s18_s15, %s18_s15 }
   0x6   :  { %p25_p3 = por %p24_p2, %p23_p1 }
   0x8   :  { %p26_p4 = pnand %p25_p3, %p19_p0 }
   0xa   :  { %29 = shalt.err (!%p26_p4)  }
   0xb   :  { %8 = dma.vmem_to_hbm [thread:$0]  %s6_s14, 256, %s94_s2, [#allocation0] }
   0xc   :  { %61 = dma.done.wait [#allocation0], 256  }
   0xd   :  { %62 = vsyncadd [#allocation0], 4294967040 }
   0xe   :  { %10 = vsyncpa [#allocation0], 1 }
   0xf   :  { %11 = vsyncpa [#allocation1], 0  ;;  %s12_s0 = sshll.u32 %s93_s1, 4  ;;  %s13_s0 = int_to_ptr.vmem [resolvable:$true] %s12_s0 }
  0x10   :  { %s38_s20 = scalar_lea.vmem %s13_s0, 256  ;;  %p43_p6 = scmp.lt.s32.totalorder %s13_s0, %s13_s0 }
  0x11   :  { %p39_p5 = scmp.ne.s32.totalorder %s13_s0, %s38_s20  ;;  %p44_p7 = scmp.lt.s32.totalorder %s38_s20, %s38_s20 }
  0x13   :  { %p45_p8 = por %p44_p7, %p43_p6 }
  0x15   :  { %p46_p9 = pnand %p45_p8, %p39_p5 }
  0x17   :  { %49 = shalt.err (!%p46_p9)  }
  0x18   :  { %15 = dma.vmem_to_hbm [thread:$0]  %s13_s0, 256, %s3_s11, [#allocation1] }
  0x19   :  { %63 = dma.done.wait [#allocation1], 256  }
  0x1a   :  { %64 = vsyncadd [#allocation1], 4294967040 }
  0x1b   :  { %17 = vsyncpa [#allocation1], 1 }

// kernel: fwd.1
= control target key start
LH: loop header
LB: loop body
LE: loop exit
PB: predicated region body
PF: predicated region fallthrough
CT: control target
= control target key end

     0   :  { %vm18_vm0 = vcmask 64512   ;;  %v358_v16 = vmov 683565275   ;;  %v359_v18 = vmov 2475754826   ;;  %s442_s0 = inlined_call_operand.vmem [shape: f32[8,128], index: 0, kind: input, shape index: {}]   ;;  %s443_s1 = inlined_call_operand.vmem [shape: f32[48,8], index: 1, kind: input, shape index: {}]   ;;  %s444_s2 = inlined_call_operand.vmem [shape: f32[32,128], index: 2, kind: output, shape index: {}]  }
   0x1   :  { %v17_v0 = vld [vmem:[%s442_s0] sm:$0xff]  ;;  %v12_v2 = vld [vmem:[%s443_s1 + $0x8] sm:$0xff]  ;;  %v13_v3 = vld [vmem:[%s443_s1 + $0x10] sm:$0xff]  ;;  %v360_v21 = vmov 2131351028  }
   0x2   :  { %v11_v1 = vld [vmem:[%s443_s1] sm:$0xff]  ;;  %329 = vmatprep.subr.mxu0 %v17_v0  ;;  %336 = vmatprep.mubr.msk.f32.mxu1 %vm18_vm0, %v13_v3  ;;  %v361_v24 = vmov 2102212464   ;;  %v362_v27 = vmov 920167782  }
   0x3   :  { %331 = vmatprep.mubr.msk.f32.mxu0 %vm18_vm0, %v11_v1  ;;  %330 = vmatpush3.msra.mxu0 %v17_v0  ;;  %v363_v30 = vmov 1326507024  }
   0x4   :  { %332 = vmatmul.mubr.msk.f32.vlgmr.msra.gmra.mxu0 %vm18_vm0, %v12_v2 }
  0xc4   :  { %v394_v4 = vpop.f32.mrf.mxu0 }
  0xc6   :  { %v396_v5 = vpop.f32.mrf.mxu0 }
  0xc7   :  { %v105_v6 = vand.u32 2139095040, %v396_v5  ;;  %v102_v10 = vand.u32 2147483647, %v396_v5  ;;  %vm104_vm8 = vcmp.lt.s32.totalorder %v396_v5, 0  ;;  %vm194_vm13 = vweird.f32 %v396_v5 }
  0xc9   :  { %v106_v7 = vshrl.u32 %v105_v6, 23  ;;  %v109_v13 = vand.u32 8388607, %v102_v10  ;;  %vm103_vm9 = vcmp.le.f32.partialorder %v102_v10, 0.7853982 }
  0xcb   :  { %v313_v8 = vadd.s32 4294967169, %v106_v7  ;;  %v110_v32 = vor.u32 8388608, %v109_v13 }
  0xcd   :  { %v112_v9 = vadd.s32 1, %v313_v8  ;;  %v150_v46 = vshll.u32 %v110_v32, 8 }
  0xcf   :  { %vm113_vm1 = vcmp.gt.s32.totalorder %v112_v9, 0 }
  0xd0   :  { %v114_v11 = vsel %vm113_vm1, %v112_v9, 0 }
  0xd1   :  { %v116_v12 = vand.u32 31, %v114_v11  ;;  %v115_v15 = vshrl.u32 %v114_v11, 5 }
  0xd3   :  { %v117_v14 = vsub.s32 32, %v116_v12  ;;  %v119_v17 = vshll.u32 %v358_v16, %v116_v12  ;;  %v122_v19 = vshll.u32 %v359_v18, %v116_v12  ;;  %v125_v23 = vshll.u32 %v360_v21, %v116_v12 }
  0xd4   :  { %v128_v26 = vshll.u32 %v361_v24, %v116_v12  ;;  %v131_v29 = vshll.u32 %v362_v27, %v116_v12  ;;  %vm134_vm2 = vcmp.lt.s32.totalorder %v115_v15, 1  ;;  %vm137_vm3 = vcmp.lt.s32.totalorder %v115_v15, 4 }
  0xd5   :  { %v120_v20 = vshrl.u32 %v359_v18, %v117_v14  ;;  %v123_v22 = vshrl.u32 %v360_v21, %v117_v14  ;;  %v126_v25 = vshrl.u32 %v361_v24, %v117_v14  ;;  %v129_v28 = vshrl.u32 %v362_v27, %v117_v14 }
  0xd6   :  { %v132_v31 = vshrl.u32 %v363_v30, %v117_v14  ;;  %v118_v41 = vshrl.u32 %v358_v16, %v117_v14  ;;  %vm136_vm4 = vcmp.lt.s32.totalorder %v115_v15, 3  ;;  %vm135_vm5 = vcmp.lt.s32.totalorder %v115_v15, 2 }
  0xd7   :  { %v121_v33 = vor.u32 %v120_v20, %v119_v17  ;;  %v124_v34 = vor.u32 %v123_v22, %v122_v19  ;;  %v127_v35 = vor.u32 %v126_v25, %v125_v23  ;;  %v130_v36 = vor.u32 %v129_v28, %v128_v26 }
  0xd8   :  { %v133_v37 = vor.u32 %v132_v31, %v131_v29  ;;  %v100_v24 = vmul.f32 1.442695, %v394_v4  ;;  %v14_v4 = vld [vmem:[%s443_s1 + $0x18] sm:$0xff] }
  0xd9   :  { %v139_v38 = vsel %vm137_vm3, %v127_v35, 2102212464  ;;  %v142_v39 = vsel %vm134_vm2, %v121_v33, %v124_v34  ;;  %v146_v40 = vsel %vm134_vm2, %v124_v34, %v127_v35  ;;  %v143_v42 = vsel %vm137_vm3, %v130_v36, 920167782 }
  0xda   :  { %v147_v43 = vsel %vm137_vm3, %v133_v37, 1326507024  ;;  %v144_v44 = vsel %vm136_vm4, %v127_v35, %v143_v42  ;;  %v138_v47 = vsel %vm134_vm2, %v118_v41, %v121_v33  ;;  %v140_v48 = vsel %vm136_vm4, %v124_v34, %v139_v38  ;;  %v15_v37 = vld [vmem:[%s443_s1 + $0x20] sm:$0xff] }
  0xdb   :  { %v148_v45 = vsel %vm136_vm4, %v130_v36, %v147_v43  ;;  %v145_v49 = vsel %vm135_vm5, %v142_v39, %v144_v44  ;;  %v141_v55 = vsel %vm135_vm5, %v138_v47, %v140_v48 }
  0xdc   :  { %v149_v50 = vsel %vm135_vm5, %v146_v40, %v148_v45  ;;  %v405_v53 = vmul.u32.u64.low %v150_v46, %v145_v49  ;;  %v406_v54 = vmul.u32.u64.high %v150_v46, %v145_v49, %v405_v53  ;;  %v157_v57 = vmul.u32 %v150_v46, %v141_v55 }
  0xdd   :  { %v402_v51 = vmul.u32.u64.low %v150_v46, %v149_v50  ;;  %v403_v52 = vmul.u32.u64.high %v150_v46, %v149_v50, %v402_v51 }
  0xde   :  { %v160_v56 = vadd.s32 1, %v406_v54 }
  0xdf   :  { %vm159_vm6 = vc.u32 %v403_v52, %v405_v53  ;;  %v158_v7 = vadd.s32 %v405_v53, %v403_v52 }
  0xe0   :  { %v161_v58 = vsel %vm159_vm6, %v160_v56, %v406_v54 }
  0xe1   :  { %v162_v59 = vadd.s32 %v161_v58, %v157_v57 }
  0xe3   :  { %v163_v60 = vadd.s32 536870912, %v162_v59 }
  0xe5   :  { %v164_v61 = vshrl.u32 %v163_v60, 30 }
  0xe7   :  { %v165_v62 = vshll.u32 %v164_v61, 30  ;;  %v188_v23 = vsub.s32 4, %v164_v61 }
  0xe9   :  { %v166_v63 = vsub.s32 %v162_v59, %v165_v62  ;;  %v189_v25 = vsel %vm104_vm8, %v188_v23, %v164_v61 }
  0xea   :  { %v191_v26 = vsel %vm103_vm9, 0, %v189_v25 }
  0xeb   :  { %v168_v0 = vsub.s32 0, %v166_v63  ;;  %v195_v27 = vand.u32 3, %v191_v26 }
  0xed   :  { %v314_v1 = vmin.u32 %v168_v0, %v166_v63  ;;  %vm200_vm10 = vcmp.eq.s32.totalorder %v195_v27, 2  ;;  %vm197_vm11 = vcmp.eq.s32.totalorder %v195_v27, 0  ;;  %vm196_vm12 = vcmp.lt.s32.totalorder %v195_v27, 2 }
  0xef   :  { %v170_v2 = vclz %v314_v1 }
  0xf1   :  { %v315_v3 = vadd.s32 4294967294, %v170_v2 }
  0xf3   :  { %vm316_vm7 = vcmp.lt.s32.totalorder %v315_v3, 0 }
  0xf4   :  { %v173_v6 = vsel %vm316_vm7, 0, %v315_v3 }
  0xf5   :  { %v174_v8 = vsub.s32 32, %v173_v6  ;;  %v178_v9 = vsub.s32 4294967266, %v173_v6  ;;  %v175_v11 = vshll.u32 %v166_v63, %v173_v6 }
  0xf7   :  { %v176_v12 = vshrl.u32 %v158_v7, %v174_v8  ;;  %v179_v13 = vadd.s32 127, %v178_v9 }
  0xf9   :  { %v177_v14 = vor.u32 %v176_v12, %v175_v11  ;;  %v180_v15 = vshll.u32 %v179_v13, 23 }
  0xfb   :  { %v181_v16 = vor.u32 4788187, %v180_v15  ;;  %v184_v18 = vcvt.s32.f32 %v177_v14 }
  0xfd   :  { %v182_v17 = vand.u32 2147483647, %v181_v16 }
  0xff   :  { %v185_v19 = vmul.f32 %v184_v18, %v182_v17 }
 0x101   :  { %v186_v20 = vxor.u32 2147483648, %v185_v19 }
 0x103   :  { %v187_v21 = vsel %vm104_vm8, %v186_v20, %v185_v19 }
 0x104   :  { %v190_v22 = vsel %vm103_vm9, %v396_v5, %v187_v21  ;;  %v16_v5 = vld [vmem:[%s443_s1 + $0x28] sm:$0xff] }
 0x105   :  { %352 = vcosq.f32 %v190_v22 }
 0x106   :  { %354 = vsinq.f32 %v190_v22 }
 0x107   :  { %356 = vpow2.f32 %v100_v24 }
 0x112   :  { %v353_v28 = vpop.eup %352 }
 0x113   :  { %v355_v29 = vpop.eup %354  ;;  %v201_v30 = vxor.u32 2147483648, %v353_v28 }
 0x114   :  { %v198_v31 = vxor.u32 2147483648, %v355_v29  ;;  %v357_v34 = vpop.eup %356 }
 0x115   :  { %v202_v32 = vsel %vm200_vm10, %v201_v30, %v355_v29 }
 0x116   :  { %v199_v10 = vsel %vm197_vm11, %v353_v28, %v198_v31 }
 0x117   :  { %v203_v33 = vsel %vm196_vm12, %v199_v10, %v202_v32 }
 0x118   :  { %v204_v35 = vsel %vm194_vm13, nan, %v203_v33 }
 0x119   :  { %v205_v36 = vmul.f32 %v357_v34, %v204_v35 }
 0x11b   :  { %334 = vmatprep.subr.mxu1 %v205_v36 }
 0x11c   :  { %335 = vmatpush3.msra.mxu1 %v205_v36 }
 0x11d   :  { %337 = vmatmul.mubr.msk.f32.vlgmr.msra.gmra.mxu1 %vm18_vm0, %v14_v4 }
 0x11e   :  { %339 = vmatprep.mubr.msk.f32.mxu1 %vm18_vm0, %v15_v37 }
 0x121   :  { %340 = vmatmul.mubr.msk.f32.gmra.mxu1 %vm18_vm0, %v16_v5 }
 0x1dd   :  { %v338_v38 = vpop.f32.mrf.mxu1 }
 0x1de   :  { %304 = vst [vmem:[%s444_s2 + $0x8] sm:$0xff] %v338_v38 }
 0x1df   :  { %v284_v39 = vpop.f32.mrf.mxu1 }
 0x1e0   :  { %303 = vst [vmem:[%s444_s2] sm:$0xff] %v284_v39 }
 0x1e1   :  { %v341_v40 = vpop.f32.mrf.mxu1 }
 0x1e2   :  { %306 = vst [vmem:[%s444_s2 + $0x18] sm:$0xff] %v341_v40 }
 0x1e3   :  { %v294_v41 = vpop.f32.mrf.mxu1 }
 0x1e4   :  { %305 = vst [vmem:[%s444_s2 + $0x10] sm:$0xff] %v294_v41 }

</bundles_post_ra>
